<compile_context>
chip_gen: v7x
topology: tpu7x:2x2x1
jax: 0.10.0
libtpu: 0.0.40
codegen_flags: <defaults>
</compile_context>

<pallas_src>
import math

import jax
import jax.numpy as jnp
from jax.experimental import pallas as pl
from jax.experimental.pallas import tpu as pltpu


def _round_up(x, m):
    return ((x + m - 1) // m) * m


def _cdiv(a, b):
    return -(-a // b)


def _vmem_limit_bytes():
    """Generation-aware scoped-VMEM limit: ~75% of physical, capped at 100 MiB."""
    try:
        info = pltpu.get_tpu_info()
        cap = getattr(info, "vmem_capacity_bytes", None)
        if cap:
            return int(min(100 * 1024 * 1024, (int(cap) * 3) // 4))
    except Exception:
        pass
    return 32 * 1024 * 1024  # conservative fallback (safe on every generation)


def phm_linear_kernel(x_ref, wt_ref, b_ref, o_ref):
    """One (tm, tn) f32 output tile; accumulates directly into o_ref over the K axis."""
    k = pl.program_id(2)

    @pl.when(k == 0)
    def _():
        o_ref[...] = jnp.zeros_like(o_ref)

    # MXU matmul with f32 accumulation; W^T is pre-built so no in-kernel transpose.
    o_ref[...] += jnp.dot(x_ref[...], wt_ref[...],
                          preferred_element_type=jnp.float32)

    @pl.when(k == pl.num_programs(2) - 1)
    def _():
        o_ref[...] += b_ref[...]   # (1, tn) bias broadcast over sublanes


def _weight_spec(tk, tn, deep_buffer):
    """W^T tile spec; optionally 3-deep buffered for small-batch (DMA-exposed) shapes."""
    idx = lambda i, j, k: (k, j)
    if deep_buffer:
        try:
            return pl.BlockSpec((tk, tn), idx, pipeline_mode=pl.Buffered(3))
        except TypeError:  # older BlockSpec signature without pipeline_mode
            pass
    return pl.BlockSpec((tk, tn), idx)


def kronecker_product1(a, s):
    """Exact port of PHMLinear.kronecker_product1 (used only by the reference check)."""
    siz1 = (a.shape[-2] * s.shape[-2], a.shape[-1] * s.shape[-1])
    res = a[..., :, None, :, None] * s[..., None, :, None, :]
    siz0 = res.shape[:-4]
    return res.reshape(siz0 + siz1)


def phm_linear(x, A, S, bias, *, compute_dtype=jnp.bfloat16,
               tm_max=512, tn_max=1024, tk_max=2048):
    """PHMLinear forward: fused Kronecker-sum weight + tiled Pallas linear layer."""
    n = A.shape[0]
    o2, i2 = S.shape[1], S.shape[2]
    out_features = o2 * n
    in_features = i2 * n

    lead = x.shape[:-1]
    x2 = x.reshape(-1, in_features)
    M, K, N = x2.shape[0], in_features, out_features

    # Fused weight assembly, built directly as W^T (in, out):
    #   W^T[q*i2+c, p*o2+r] = sum_i A[i,p,q] * S[i,r,c]
    Wt = jnp.einsum("ipq,irc->qcpr", A, S).reshape(in_features, out_features)

    # Tile selection: sublane axis multiple of 8, lane axes multiples of 128,
    # caps chosen so the double-buffered bf16 footprint stays well under VMEM
    # on every generation (incl. v7x's 64 MiB).
    tm = min(tm_max, _round_up(M, 8))
    tn = min(tn_max, _round_up(N, 128))
    tk = min(tk_max, _round_up(K, 128))
    # v7x megacore: prefer >=2 output tiles along the parallel axes when N allows it.
    while _cdiv(M, tm) * _cdiv(N, tn) < 2 and tn % 256 == 0:
        tn //= 2

    # Only the K (reduction) axis needs zero padding; partial M/N edge blocks are
    # handled by the cdiv grid (OOB output writes are dropped, extra x rows / W^T
    # columns only feed output elements that never reach HBM).
    Kp = _round_up(K, tk)
    x_c = x2.astype(compute_dtype)
    wt_c = Wt.astype(compute_dtype)
    if Kp != K:
        x_c = jnp.pad(x_c, ((0, 0), (0, Kp - K)))
        wt_c = jnp.pad(wt_c, ((0, Kp - K), (0, 0)))
    b_c = bias.astype(jnp.float32).reshape(1, N)

    grid = (_cdiv(M, tm), _cdiv(N, tn), Kp // tk)
    # Deepen W^T pipelining only where it pays off: tiny batch (compute per tile
    # negligible) and enough streamed tiles for a 3rd buffer to matter.
    deep_buffer = (M <= 128) and (grid[1] * grid[2] >= 3)

    out = pl.pallas_call(
        phm_linear_kernel,
        out_shape=jax.ShapeDtypeStruct((M, N), jnp.float32),
        grid=grid,
        in_specs=[
            pl.BlockSpec((tm, tk), lambda i, j, k: (i, k)),   # x tile
            _weight_spec(tk, tn, deep_buffer),                # W^T tile
            pl.BlockSpec((1, tn), lambda i, j, k: (0, j)),    # bias tile
        ],
        out_specs=pl.BlockSpec((tm, tn), lambda i, j, k: (i, j)),
        compiler_params=pltpu.CompilerParams(
            dimension_semantics=("parallel", "parallel", "arbitrary"),
            vmem_limit_bytes=_vmem_limit_bytes(),
        ),
    )(x_c, wt_c, b_c)

    return out.reshape(lead + (out_features,))


if __name__ == "__main__":
    # Small shapes consistent with the module: n must divide in/out features.
    n, in_features, out_features, batch = 4, 64, 64, 8
    o2, i2 = out_features // n, in_features // n

    key = jax.random.PRNGKey(0)
    ka, ks, kb, kx = jax.random.split(key, 4)

    # Deterministic parameter init mirroring the PyTorch __init__:
    # A: xavier_uniform on (n, n, n); torch fan_in = fan_out = n*n.
    a_bound = math.sqrt(6.0 / (n * n + n * n))
    A = jax.random.uniform(ka, (n, n, n), jnp.float32, -a_bound, a_bound)

    # S: xavier_uniform on (n, out//n, in//n); torch fan_in = o2*i2, fan_out = n*i2.
    s_bound = math.sqrt(6.0 / (o2 * i2 + n * i2))
    S = jax.random.uniform(ks, (n, o2, i2), jnp.float32, -s_bound, s_bound)

    # bias: uniform(-1/sqrt(fan_in), 1/sqrt(fan_in)) with fan_in = in_features.
    b_bound = 1.0 / math.sqrt(in_features)
    bias = jax.random.uniform(kb, (out_features,), jnp.float32, -b_bound, b_bound)

    x = jax.random.normal(kx, (batch, in_features), jnp.float32)

    # Pure-JAX reference for the same forward pass (original Kronecker formulation).
    W_ref = jnp.sum(kronecker_product1(A, S), axis=0)    # (out, in)
    y_ref = x @ W_ref.T + bias

    # --- f32 compute path (exact check, also validates the fused-einsum W^T) ---
    y_f32 = jax.block_until_ready(phm_linear(x, A, S, bias, compute_dtype=jnp.float32))
    assert y_f32.shape == (batch, out_features)
    assert jnp.allclose(y_f32, y_ref, atol=1e-5, rtol=1e-5), "f32 mismatch vs reference"

    # --- ragged batch (exercises un-padded partial M/N edge blocks) ---
    y_rag = jax.block_until_ready(phm_linear(x[:5], A, S, bias, compute_dtype=jnp.float32))
    assert y_rag.shape == (5, out_features)
    assert jnp.allclose(y_rag, y_ref[:5], atol=1e-5, rtol=1e-5), "ragged-M mismatch"

    # --- bf16 compute path (default: MXU fast path, f32 accumulation) ---
    y_bf16 = jax.block_until_ready(phm_linear(x, A, S, bias))
    x_r = x.astype(jnp.bfloat16).astype(jnp.float32)
    w_r = W_ref.astype(jnp.bfloat16).astype(jnp.float32)
    y_bf16_ref = x_r @ w_r.T + bias
    assert jnp.allclose(y_bf16, y_bf16_ref, atol=1e-4, rtol=1e-4), "bf16 mismatch vs reference"

    print("KERNEL_OK")
</pallas_src>

<mosaic_0001>
module attributes {stable_mosaic.version = 11 : i64} {
  func.func @phm_linear_kernel(%arg0: i32, %arg1: i32, %arg2: i32, %arg3: memref<8x128xf32, #tpu.memory_space<vmem>>, %arg4: memref<128x128xf32, #tpu.memory_space<vmem>>, %arg5: memref<1x128xf32, #tpu.memory_space<vmem>>, %arg6: memref<8x128xf32, #tpu.memory_space<vmem>>) attributes {dimension_semantics = [#tpu.dimension_semantics<parallel>, #tpu.dimension_semantics<parallel>, #tpu.dimension_semantics<arbitrary>], iteration_bounds = array<i64: 1, 1, 1>, scalar_prefetch = 0 : i64, scratch_operands = 0 : i64, tpu.core_type = #tpu.core_type<tc>, window_params = [{transform_indices = @transform_0, window_bounds = array<i64: 8, 128>}, {transform_indices = @transform_1, window_bounds = array<i64: 128, 128>}, {transform_indices = @transform_2, window_bounds = array<i64: 1, 128>}, {transform_indices = @transform_3, window_bounds = array<i64: 8, 128>}]} {
    %c0_i32 = arith.constant 0 : i32
    %0 = arith.cmpi eq, %arg2, %c0_i32 : i32
    %1 = arith.extui %0 : i1 to i32
    %c0_i32_0 = arith.constant 0 : i32
    %2 = arith.cmpi ne, %1, %c0_i32_0 : i32
    scf.if %2 {
      %cst_10 = arith.constant 0.000000e+00 : f32
      %12 = vector.broadcast %cst_10 : f32 to vector<8x128xf32>
      %c0_11 = arith.constant 0 : index
      %c0_12 = arith.constant 0 : index
      %13 = vector.load %arg6[%c0_11, %c0_12] : memref<8x128xf32, #tpu.memory_space<vmem>>, vector<8x128xf32>
      tpu.vector_store %arg6[%c0_11, %c0_12], %12 {strides = array<i32>} : memref<8x128xf32, #tpu.memory_space<vmem>>, vector<8x128xf32>,
    } else {
    }
    %c0 = arith.constant 0 : index
    %c0_1 = arith.constant 0 : index
    %3 = vector.load %arg6[%c0, %c0_1] : memref<8x128xf32, #tpu.memory_space<vmem>>, vector<8x128xf32>
    %c0_2 = arith.constant 0 : index
    %c0_3 = arith.constant 0 : index
    %4 = vector.load %arg3[%c0_2, %c0_3] : memref<8x128xf32, #tpu.memory_space<vmem>>, vector<8x128xf32>
    %c0_4 = arith.constant 0 : index
    %c0_5 = arith.constant 0 : index
    %5 = vector.load %arg4[%c0_4, %c0_5] : memref<128x128xf32, #tpu.memory_space<vmem>>, vector<128x128xf32>
    %cst = arith.constant dense<0.000000e+00> : vector<8x128xf32>
    %6 = tpu.matmul %4, %5, %cst {dimension_numbers = #tpu.dot_dimension_numbers<[1], [0], [0], [1], [0, 0, 1, 1], [], []>} : vector<8x128xf32>, vector<128x128xf32>, vector<8x128xf32> -> vector<8x128xf32>
    %7 = arith.addf %3, %6 : vector<8x128xf32>
    %c0_6 = arith.constant 0 : index
    %c0_7 = arith.constant 0 : index
    %8 = vector.load %arg6[%c0_6, %c0_7] : memref<8x128xf32, #tpu.memory_space<vmem>>, vector<8x128xf32>
    tpu.vector_store %arg6[%c0_6, %c0_7], %7 {strides = array<i32>} : memref<8x128xf32, #tpu.memory_space<vmem>>, vector<8x128xf32>,
    %c0_i32_8 = arith.constant 0 : i32
    %9 = arith.cmpi eq, %arg2, %c0_i32_8 : i32
    %10 = arith.extui %9 : i1 to i32
    %c0_i32_9 = arith.constant 0 : i32
    %11 = arith.cmpi ne, %10, %c0_i32_9 : i32
    scf.if %11 {
      %c0_10 = arith.constant 0 : index
      %c0_11 = arith.constant 0 : index
      %12 = vector.load %arg6[%c0_10, %c0_11] : memref<8x128xf32, #tpu.memory_space<vmem>>, vector<8x128xf32>
      %c0_12 = arith.constant 0 : index
      %c0_13 = arith.constant 0 : index
      %13 = vector.load %arg5[%c0_12, %c0_13] : memref<1x128xf32, #tpu.memory_space<vmem>>, vector<1x128xf32>
      %14 = vector.broadcast %13 : vector<1x128xf32> to vector<8x128xf32>
      %15 = arith.addf %12, %14 : vector<8x128xf32>
      %c0_14 = arith.constant 0 : index
      %c0_15 = arith.constant 0 : index
      %16 = vector.load %arg6[%c0_14, %c0_15] : memref<8x128xf32, #tpu.memory_space<vmem>>, vector<8x128xf32>
      tpu.vector_store %arg6[%c0_14, %c0_15], %15 {strides = array<i32>} : memref<8x128xf32, #tpu.memory_space<vmem>>, vector<8x128xf32>,
    } else {
    }
    return
  }
  func.func @transform_0(%arg0: i32, %arg1: i32, %arg2: i32) -> (i32, i32) {
    %c0_i32 = arith.constant 0 : i32
    return %arg0, %arg2 : i32, i32
  }
  func.func @transform_1(%arg0: i32, %arg1: i32, %arg2: i32) -> (i32, i32) {
    %c0_i32 = arith.constant 0 : i32
    return %arg2, %arg1 : i32, i32
  }
  func.func @transform_2(%arg0: i32, %arg1: i32, %arg2: i32) -> (i32, i32) {
    %c0_i32 = arith.constant 0 : i32
    %c0_i32_0 = arith.constant 0 : i32
    return %c0_i32, %arg1 : i32, i32
  }
  func.func @transform_3(%arg0: i32, %arg1: i32, %arg2: i32) -> (i32, i32) {
    %c0_i32 = arith.constant 0 : i32
    return %arg0, %arg1 : i32, i32
  }
}

</mosaic_0001>

<bundles_post_ra>
// kernel: tpu_custom_call.1
= control target key start
LH: loop header
LB: loop body
LE: loop exit
PB: predicated region body
PF: predicated region fallthrough
CT: control target
= control target key end

     0   :  { %v242_v3 = vmov 0.0|0.0   ;;  %vm243_vm0 = vmmov 0   ;;  %v244_v6 = vmov 0.0   ;;  %s332_s0 = inlined_call_operand.vmem [shape: f32[8,128], index: 0, kind: input, shape index: {}]   ;;  %s333_s1 = inlined_call_operand.vmem [shape: f32[128,64], index: 1, kind: input, shape index: {}]   ;;  %s334_s2 = inlined_call_operand.vmem [shape: f32[1,64], index: 2, kind: input, shape index: {}]   ;;  %s335_s3 = inlined_call_operand.hbm [shape: f32[8,64], index: 3, kind: output, shape index: {}]  }
   0x1   :  { %v22_v0 = vld [vmem:[%s333_s1] sm:$0xff]  ;;  %v23_v1 = vld [vmem:[%s333_s1 + $0x8] sm:$0xff]  ;;  %v24_v2 = vld [vmem:[%s333_s1 + $0x10] sm:$0xff]  ;;  %190 = vmatprep.subr.bf16.mxu0 %v242_v3  ;;  %187 = vmatprep.mubr.msk.f32.mxu0 %vm243_vm0, %v244_v6 }
   0x2   :  { %v191_v4 = vpack.c.bf16 %v23_v1, %v22_v0  ;;  %v25_v5 = vld [vmem:[%s333_s1 + $0x18] sm:$0xff]  ;;  %v26_v8 = vld [vmem:[%s333_s1 + $0x20] sm:$0xff]  ;;  %v27_v9 = vld [vmem:[%s333_s1 + $0x28] sm:$0xff] }
   0x3   :  { %v194_v7 = vpack.c.bf16 %v25_v5, %v24_v2 }
   0x4   :  { %192 = vmatpush3.bf16.msra.mxu0 %v191_v4 }
   0x5   :  { %193 = vmatprep.subr.bf16.mxu0 %v242_v3 }
   0x6   :  { %8 = vsyncpa [#allocation3], 0  ;;  %v197_v10 = vpack.c.bf16 %v27_v9, %v26_v8  ;;  %v28_v11 = vld [vmem:[%s333_s1 + $0x30] sm:$0xff]  ;;  %v29_v12 = vld [vmem:[%s333_s1 + $0x38] sm:$0xff]  ;;  %s245_s21 = smov [#allocation2]  }
   0x7   :  { %v200_v13 = vpack.c.bf16 %v29_v12, %v28_v11  ;;  %v30_v14 = vld [vmem:[%s333_s1 + $0x40] sm:$0xff]  ;;  %v31_v15 = vld [vmem:[%s333_s1 + $0x48] sm:$0xff]  ;;  %v32_v17 = vld [vmem:[%s333_s1 + $0x50] sm:$0xff]  ;;  %s129_s22 = sshll.u32 %s245_s21, 4  ;;  %s130_s22 = int_to_ptr.vmem [resolvable:$true] %s129_s22 }
   0x8   :  { %195 = vmatpush3.bf16.msra.mxu0 %v194_v7  ;;  %v203_v16 = vpack.c.bf16 %v31_v15, %v30_v14  ;;  %v33_v18 = vld [vmem:[%s333_s1 + $0x58] sm:$0xff]  ;;  %v34_v20 = vld [vmem:[%s333_s1 + $0x60] sm:$0xff]  ;;  %v35_v21 = vld [vmem:[%s333_s1 + $0x68] sm:$0xff]  ;;  %p223_p1 = scmp.lt.s32.totalorder %s130_s22, %s130_s22 }
   0x9   :  { %196 = vmatprep.subr.bf16.mxu0 %v242_v3  ;;  %v206_v19 = vpack.c.bf16 %v33_v18, %v32_v17  ;;  %v209_v22 = vpack.c.bf16 %v35_v21, %v34_v20  ;;  %v36_v23 = vld [vmem:[%s333_s1 + $0x70] sm:$0xff]  ;;  %v37_v24 = vld [vmem:[%s333_s1 + $0x78] sm:$0xff]  ;;  %v21_v26 = vld [vmem:[%s332_s0] sm:$0xff]  ;;  %s218_s1 = scalar_lea.vmem %s130_s22, 128 }
   0xa   :  { %v212_v25 = vpack.c.bf16 %v37_v24, %v36_v23  ;;  %v137_v28 = vld [vmem:[%s334_s2] ss:$0 sm:$0xff]  ;;  %p219_p0 = scmp.ne.s32.totalorder %s130_s22, %s218_s1  ;;  %p224_p2 = scmp.lt.s32.totalorder %s218_s1, %s218_s1 }
   0xc   :  { %198 = vmatpush3.bf16.msra.mxu0 %v197_v10  ;;  %p225_p3 = por %p224_p2, %p223_p1 }
   0xd   :  { %199 = vmatprep.subr.bf16.mxu0 %v242_v3 }
   0xe   :  { %p226_p4 = pnand %p225_p3, %p219_p0 }
  0x10   :  { %201 = vmatpush3.bf16.msra.mxu0 %v200_v13 }
  0x11   :  { %202 = vmatprep.subr.bf16.mxu0 %v242_v3 }
  0x14   :  { %204 = vmatpush3.bf16.msra.mxu0 %v203_v16 }
  0x15   :  { %205 = vmatprep.subr.bf16.mxu0 %v242_v3 }
  0x18   :  { %207 = vmatpush3.bf16.msra.mxu0 %v206_v19 }
  0x19   :  { %208 = vmatprep.subr.bf16.mxu0 %v242_v3 }
  0x1c   :  { %210 = vmatpush3.bf16.msra.mxu0 %v209_v22 }
  0x1d   :  { %211 = vmatprep.subr.bf16.mxu0 %v242_v3 }
  0x20   :  { %213 = vmatpush3.bf16.msra.mxu0 %v212_v25 }
  0x23   :  { %188 = vmatmul.mubr.f32.vlgmr.msra.gmra.mrb[0].mxu0 %v21_v26 }
  0xf6   :  { %v104_v27 = vpop.f32.mrb[0].mxu0 }
  0xf7   :  { %v189_v29 = vpop.f32.mrb[1].mxu0  ;;  %v121_v30 = vadd.f32 %v137_v28, %v104_v27 }
  0xf9   :  { %122 = vst [vmem:[#allocation2] sm:$0xff] %v121_v30 }
  0xfa   :  { %229 = shalt.err (!%p226_p4)
}
  0xfb   :  { %s230_s24 = scalar_lea.hbm %s335_s3, 128 }
  0xfc   :  { %p231_p5 = scmp.ne.s32.totalorder %s335_s3, %s230_s24  ;;  %p234_p6 = scmp.lt.u32.totalorder %s230_s24, %s335_s3 }
  0xfe   :  { %p236_p7 = pnand %p234_p6, %p231_p5 }
 0x100   :  { %239 = shalt.err (!%p236_p7)
}
 0x101   :  { %132 = dma.vmem_to_hbm [thread:$0]  %s130_s22, 128, %s335_s3, [#allocation3]  }
 0x102   :  { %240 = dma.done.wait [#allocation3], 128  }
 0x103   :  { %241 = vsyncadd [#allocation3], 4294967168 }
 0x104   :  { %136 = vsyncpa [#allocation3], 1 }

</bundles_post_ra>
